<compile_context>
chip_gen: v5e
topology: v5e:2x2
jax: 0.10.0
libtpu: 0.0.40
codegen_flags: <defaults>
</compile_context>

<pallas_src>
import jax
import jax.numpy as jnp
from jax import lax
from jax.experimental import pallas as pl
from jax.experimental.pallas import tpu as pltpu

TM_MAX = 4096   # row-tile cap (multiple of 128)
O_PAD = 8       # output features padded 4 -> 8 (one sublane group)


def _round_up(a, b):
    return ((a + b - 1) // b) * b


def _mlp_kernel(x_ref, w1_ref, b1_ref, w2t_ref, b2t_ref, o_ref):
    # x: (TM, d)   w1: (d, H)   b1: (1, H)
    # w2t: (O_PAD, H)   b2t: (O_PAD, 1)   o: (O_PAD, TM)  -- transposed output
    h = jnp.dot(x_ref[...], w1_ref[...],
                preferred_element_type=jnp.float32) + b1_ref[...]
    h = jnp.maximum(h, 0.0)                                  # ReLU on the VPU
    # o_t[o, t] = sum_k w2t[o, k] * h[t, k]  (contract last dims -> (O_PAD, TM))
    o_t = lax.dot_general(w2t_ref[...], h,
                          dimension_numbers=(((1,), (1,)), ((), ())),
                          preferred_element_type=jnp.float32)
    o_ref[...] = (o_t + b2t_ref[...]).astype(o_ref.dtype)


def canonization_net(x, w1, b1, w2, b2):
    """x: (N, d) float32.  Returns (N, 4) float32 (rows sorted desc. by x[:,0])."""
    N, d = x.shape
    H = w1.shape[1]          # 32
    O = w2.shape[1]          # 4

    # Canonization: descending sort of rows by x[:, 0].
    # TODO(synk): torch.sort(..., descending=True) is unstable; on tied (or
    # NaN / +-0.0) keys the row *order* may differ from PyTorch, the row *set*
    # is identical.
    order = jnp.argsort(x[:, 0], descending=True)

    # Second layer pre-transposed and feature-padded 4 -> 8: the kernel writes
    # a lane-dense (8, N) output, only 32 B per original row.
    w2t = jnp.zeros((O_PAD, H), w2.dtype).at[:O, :].set(w2.T)
    b2t = jnp.zeros((O_PAD, 1), b2.dtype).at[:O, :].set(b2.reshape(O, 1))

    # Row tile: multiple of 128, capped at TM_MAX, clamped to ~N/4 so large N
    # still yields >=4 grid steps (keeps both v7x TensorCores busy).  When the
    # tile would exceed N, use a single full-array block (no padding needed).
    TM = min(TM_MAX, _round_up(pl.cdiv(N, 4), 128))
    if TM >= N:
        TM = N
    grid = (pl.cdiv(N, TM),)

    out_t = pl.pallas_call(
        _mlp_kernel,
        out_shape=jax.ShapeDtypeStruct((O_PAD, N), x.dtype),
        grid=grid,
        in_specs=[
            pl.BlockSpec((TM, d), lambda i: (i, 0)),      # row-tiled input
            pl.BlockSpec((d, H), lambda i: (0, 0)),       # resident weights
            pl.BlockSpec((1, H), lambda i: (0, 0)),
            pl.BlockSpec((O_PAD, H), lambda i: (0, 0)),
            pl.BlockSpec((O_PAD, 1), lambda i: (0, 0)),
        ],
        out_specs=pl.BlockSpec((O_PAD, TM), lambda i: (0, i)),
        compiler_params=pltpu.CompilerParams(
            dimension_semantics=("parallel",)),
    )(x, w1, b1, w2t, b2t)

    # Gather only the O useful rows' sorted columns (tiny (4, N) read),
    # then transpose back to (N, O).  Fused by XLA under jit.
    return out_t[:O, order].T


# Keep sort + pallas_call + gather in one jit/fusion region.
canonization_net_jit = jax.jit(canonization_net)


def _reference(x, w1, b1, w2, b2):
    order = jnp.argsort(x[:, 0], descending=True)
    xs = x[order, :]
    h = jnp.maximum(xs @ w1 + b1, 0.0)
    return h @ w2 + b2


if __name__ == "__main__":
    d = 10
    hidden = 32
    out_dim = 4

    key = jax.random.PRNGKey(0)
    kx, k1, k2, k3, k4 = jax.random.split(key, 5)

    # PyTorch-style uniform(+-1/sqrt(fan_in)) parameters.
    lim1 = 1.0 / jnp.sqrt(jnp.float32(d))
    w1 = jax.random.uniform(k1, (d, hidden), jnp.float32, -lim1, lim1)
    b1 = jax.random.uniform(k2, (1, hidden), jnp.float32, -lim1, lim1)

    lim2 = 1.0 / jnp.sqrt(jnp.float32(hidden))
    w2 = jax.random.uniform(k3, (hidden, out_dim), jnp.float32, -lim2, lim2)
    b2 = jax.random.uniform(k4, (1, out_dim), jnp.float32, -lim2, lim2)

    # Small shape matching the module (N=8 dataset elements, d=10 features).
    # Exercises the single full-array block path (TM == N).
    x_small = jax.random.normal(kx, (8, d), dtype=jnp.float32)
    out = jax.block_until_ready(canonization_net_jit(x_small, w1, b1, w2, b2))
    ref = _reference(x_small, w1, b1, w2, b2)
    assert out.shape == (8, out_dim), out.shape
    assert jnp.allclose(out, ref, atol=1e-5, rtol=1e-5), "mismatch (N=8)"

    # Mid N: multi-step grid with a partial final block (TM=128, grid=3).
    x_mid = jax.random.normal(kx, (300, d), dtype=jnp.float32)
    out_m = jax.block_until_ready(canonization_net_jit(x_mid, w1, b1, w2, b2))
    ref_m = _reference(x_mid, w1, b1, w2, b2)
    assert out_m.shape == (300, out_dim), out_m.shape
    assert jnp.allclose(out_m, ref_m, atol=1e-5, rtol=1e-5), "mismatch (N=300)"

    # Larger N: multi-tile ("parallel") row grid, partial final block.
    x_big = jax.random.normal(kx, (1000, d), dtype=jnp.float32)
    out_b = jax.block_until_ready(canonization_net_jit(x_big, w1, b1, w2, b2))
    ref_b = _reference(x_big, w1, b1, w2, b2)
    assert out_b.shape == (1000, out_dim), out_b.shape
    assert jnp.allclose(out_b, ref_b, atol=1e-5, rtol=1e-5), "mismatch (N=1000)"

    print("KERNEL_OK")
</pallas_src>

<mosaic_0001>
module attributes {stable_mosaic.version = 11 : i64} {
  func.func @_mlp_kernel(%arg0: i32, %arg1: memref<8x10xf32, #tpu.memory_space<vmem>>, %arg2: memref<10x32xf32, #tpu.memory_space<vmem>>, %arg3: memref<1x32xf32, #tpu.memory_space<vmem>>, %arg4: memref<8x32xf32, #tpu.memory_space<vmem>>, %arg5: memref<8x1xf32, #tpu.memory_space<vmem>>, %arg6: memref<8x8xf32, #tpu.memory_space<vmem>>) attributes {dimension_semantics = [#tpu.dimension_semantics<parallel>], iteration_bounds = array<i64: 1>, scalar_prefetch = 0 : i64, scratch_operands = 0 : i64, tpu.core_type = #tpu.core_type<tc>, window_params = [{transform_indices = @transform_0, window_bounds = array<i64: 8, 10>}, {pipeline_mode = #tpu.pipeline_mode<synchronous>, transform_indices = @transform_1, window_bounds = array<i64: 10, 32>}, {pipeline_mode = #tpu.pipeline_mode<synchronous>, transform_indices = @transform_2, window_bounds = array<i64: 1, 32>}, {pipeline_mode = #tpu.pipeline_mode<synchronous>, transform_indices = @transform_3, window_bounds = array<i64: 8, 32>}, {pipeline_mode = #tpu.pipeline_mode<synchronous>, transform_indices = @transform_4, window_bounds = array<i64: 8, 1>}, {transform_indices = @transform_5, window_bounds = array<i64: 8, 8>}]} {
    %c0 = arith.constant 0 : index
    %c0_0 = arith.constant 0 : index
    %0 = vector.load %arg1[%c0, %c0_0] : memref<8x10xf32, #tpu.memory_space<vmem>>, vector<8x10xf32>
    %c0_1 = arith.constant 0 : index
    %c0_2 = arith.constant 0 : index
    %1 = vector.load %arg2[%c0_1, %c0_2] : memref<10x32xf32, #tpu.memory_space<vmem>>, vector<10x32xf32>
    %cst = arith.constant dense<0.000000e+00> : vector<8x32xf32>
    %2 = tpu.matmul %0, %1, %cst {dimension_numbers = #tpu.dot_dimension_numbers<[1], [0], [0], [1], [0, 0, 1, 1], [], []>} : vector<8x10xf32>, vector<10x32xf32>, vector<8x32xf32> -> vector<8x32xf32>
    %c0_3 = arith.constant 0 : index
    %c0_4 = arith.constant 0 : index
    %3 = vector.load %arg3[%c0_3, %c0_4] : memref<1x32xf32, #tpu.memory_space<vmem>>, vector<1x32xf32>
    %4 = vector.broadcast %3 : vector<1x32xf32> to vector<8x32xf32>
    %5 = arith.addf %2, %4 : vector<8x32xf32>
    %cst_5 = arith.constant 0.000000e+00 : f32
    %6 = vector.broadcast %cst_5 : f32 to vector<8x32xf32>
    %7 = arith.maximumf %5, %6 : vector<8x32xf32>
    %c0_6 = arith.constant 0 : index
    %c0_7 = arith.constant 0 : index
    %8 = vector.load %arg4[%c0_6, %c0_7] : memref<8x32xf32, #tpu.memory_space<vmem>>, vector<8x32xf32>
    %cst_8 = arith.constant dense<0.000000e+00> : vector<8x8xf32>
    %9 = tpu.matmul %8, %7, %cst_8 {dimension_numbers = #tpu.dot_dimension_numbers<[1], [1], [0], [0], [0, 0, 1, 0], [], []>} : vector<8x32xf32>, vector<8x32xf32>, vector<8x8xf32> -> vector<8x8xf32>
    %c0_9 = arith.constant 0 : index
    %c0_10 = arith.constant 0 : index
    %10 = vector.load %arg5[%c0_9, %c0_10] : memref<8x1xf32, #tpu.memory_space<vmem>>, vector<8x1xf32>
    %11 = vector.broadcast %10 : vector<8x1xf32> to vector<8x8xf32>
    %12 = arith.addf %9, %11 : vector<8x8xf32>
    %c0_11 = arith.constant 0 : index
    %c0_12 = arith.constant 0 : index
    %13 = vector.load %arg6[%c0_11, %c0_12] : memref<8x8xf32, #tpu.memory_space<vmem>>, vector<8x8xf32>
    tpu.vector_store %arg6[%c0_11, %c0_12], %12 {strides = array<i32>} : memref<8x8xf32, #tpu.memory_space<vmem>>, vector<8x8xf32>,
    return
  }
  func.func @transform_0(%arg0: i32) -> (i32, i32) {
    %c0_i32 = arith.constant 0 : i32
    %c0_i32_0 = arith.constant 0 : i32
    return %arg0, %c0_i32 : i32, i32
  }
  func.func @transform_1(%arg0: i32) -> (i32, i32) {
    %c0_i32 = arith.constant 0 : i32
    %c0_i32_0 = arith.constant 0 : i32
    %c0_i32_1 = arith.constant 0 : i32
    return %c0_i32, %c0_i32_0 : i32, i32
  }
  func.func @transform_2(%arg0: i32) -> (i32, i32) {
    %c0_i32 = arith.constant 0 : i32
    %c0_i32_0 = arith.constant 0 : i32
    %c0_i32_1 = arith.constant 0 : i32
    return %c0_i32, %c0_i32_0 : i32, i32
  }
  func.func @transform_3(%arg0: i32) -> (i32, i32) {
    %c0_i32 = arith.constant 0 : i32
    %c0_i32_0 = arith.constant 0 : i32
    %c0_i32_1 = arith.constant 0 : i32
    return %c0_i32, %c0_i32_0 : i32, i32
  }
  func.func @transform_4(%arg0: i32) -> (i32, i32) {
    %c0_i32 = arith.constant 0 : i32
    %c0_i32_0 = arith.constant 0 : i32
    %c0_i32_1 = arith.constant 0 : i32
    return %c0_i32, %c0_i32_0 : i32, i32
  }
  func.func @transform_5(%arg0: i32) -> (i32, i32) {
    %c0_i32 = arith.constant 0 : i32
    %c0_i32_0 = arith.constant 0 : i32
    return %c0_i32, %arg0 : i32, i32
  }
}

</mosaic_0001>

<bundles_post_ra>
// kernel: custom-call
= control target key start
LH: loop header
LB: loop body
LE: loop exit
PB: predicated region body
PF: predicated region fallthrough
CT: control target
= control target key end

     0   :  { %s6_s0 = inlined_call_operand.vmem [shape: f32[8,4], index: 0, kind: output, shape index: {}]  }

// kernel: canonization_net.1
= control target key start
LH: loop header
LB: loop body
LE: loop exit
PB: predicated region body
PF: predicated region fallthrough
CT: control target
= control target key end

     0   :  { %vm31_vm0 = vcmask 1041408   ;;  %vm27_vm1 = vcmask 80896   ;;  %v103_v4 = vmov 0   ;;  %vm63_vm2 = vcmask 261120   ;;  %s155_s1 = inlined_call_operand.vmem [shape: f32[10,32], index: 1, kind: input, shape index: {}]   ;;  %s156_s0 = inlined_call_operand.vmem [shape: f32[8,10], index: 0, kind: input, shape index: {}]   ;;  %s157_s2 = inlined_call_operand.vmem [shape: f32[1,32], index: 2, kind: input, shape index: {}]   ;;  %s158_s4 = inlined_call_operand.vmem [shape: f32[8,1], index: 4, kind: input, shape index: {}]   ;;  %s159_s3 = inlined_call_operand.vmem [shape: f32[8,32], index: 3, kind: input, shape index: {}]   ;;  %s160_s5 = inlined_call_operand.vmem [shape: f32[8,8], index: 5, kind: output, shape index: {}]  }
   0x1   :  { %v22_v0 = vld [vmem:[%s155_s1 + $0x8] sm:$0x3]  ;;  %v21_v1 = vld [vmem:[%s155_s1] sm:$0xff]  ;;  %101 = vset.pattern.permute.xlu0 %v103_v4  ;;  %vm90_vm3 = vcmask 64512  }
   0x2   :  { %96 = vmatpush.msk.msra.mxu0 %vm31_vm0, %v22_v0  ;;  %v20_v2 = vld [vmem:[%s156_s0] sm:$0xff] }
   0x3   :  { %v57_v3 = vld [vmem:[%s158_s4] sm:$0xff] }
   0x4   :  { %50 = vmatpush.msra.mxu0 %v21_v1  ;;  %60 = vperm.xlu0 %101, %v57_v3   ;;  %v102_v5 = vld [vmem:[%s157_s2] ss:$0 sm:$0xff] }
   0x5   :  { %97 = vmatmul.msk.f32.vlgmr.msra.gmra.mxu0 %vm27_vm1, %v20_v2  ;;  %v56_v9 = vld [vmem:[%s159_s3] sm:$0xff] }
  0x76   :  { %v61_v10 = vpop.permute.xlu0 %60 }
  0x82   :  { %v52_v6 = vpop.f32.mrf.mxu0 }
  0x83   :  { %v53_v7 = vadd.f32 %v102_v5, %v52_v6 }
  0x85   :  { %v55_v8 = vmax.f32 %v53_v7, 0.0 }
  0x87   :  { %98 = vmatpush.xpose.msk.msra.mxu1 %vm63_vm2, %v55_v8 }
  0x8a   :  { %99 = vmatmul.msk.f32.vlgmr.msra.gmra.mxu1 %vm63_vm2, %v56_v9 }
 0x107   :  { %v87_v11 = vpop.f32.mrf.mxu1 }
 0x108   :  { %v88_v12 = vadd.f32 %v87_v11, %v61_v10 }
 0x10a   :  { %91 = vst.msk [vmem:[%s160_s5] sm:$0xff] %vm90_vm3, %v88_v12 }

</bundles_post_ra>
